<compile_context>
chip_gen: v7x
topology: tpu7x:2x2x1
jax: 0.10.0
libtpu: 0.0.40
codegen_flags: <defaults>
</compile_context>

<pallas_src>
import jax
import jax.numpy as jnp
from jax.experimental import pallas as pl
from jax.experimental.pallas import tpu as pltpu


def _round_up(a, b):
    return (a + b - 1) // b * b


def _device_config():
    """Pick (TM, vmem_limit, gelu_dtype, two_cores) for the local TPU."""
    kind = ""
    try:
        kind = jax.devices()[0].device_kind.lower()
    except Exception:
        pass
    vmem_bytes = None
    try:
        vmem_bytes = int(pltpu.get_tpu_info().vmem_capacity_bytes)
    except Exception:
        vmem_bytes = None
    if vmem_bytes is None:
        vmem_bytes = (64 if "v7" in kind else 128) * 1024 * 1024

    # bf16-native VPU/EUP only on v6e / v7x; v5e (and unknown parts) keep the
    # GELU / bias-1 math in f32 to avoid emulated bf16 element-wise ops.
    gelu_dtype = jnp.bfloat16 if ("v6" in kind or "v7" in kind) else jnp.float32

    if vmem_bytes >= 100 * 1024 * 1024:       # v5e / v6e: 128 MiB VMEM
        tm, vmem_limit = 512, 96 * 1024 * 1024
    else:                                     # v7x: 64 MiB VMEM per TC
        tm, vmem_limit = 256, 48 * 1024 * 1024

    two_cores = "v7" in kind                  # 2 TensorCores per chip
    return tm, vmem_limit, gelu_dtype, two_cores


def _make_ffn_kernel(compute_dtype, gelu_dtype):
    def kernel(x_ref, w1_ref, b1_ref, w2_ref, b2_ref, o_ref):
        # First linear: f32 x tile is cast to bf16 in-kernel (MXU inputs),
        # MXU accumulates in f32.
        x = x_ref[...].astype(compute_dtype)
        h = jnp.dot(x, w1_ref[...], preferred_element_type=jnp.float32)
        # Bias-1 add + GELU (tanh approx, matches the PyTorch GELU class) in
        # gelu_dtype (bf16 on v6e/v7x, f32 on v5e).  Python-float constants
        # are weakly typed so the whole polynomial stays in gelu_dtype.
        h = h.astype(gelu_dtype) + b1_ref[...].astype(gelu_dtype)
        g = 0.5 * h * (1.0 + jnp.tanh(
            0.7978845608028654 * (h + 0.044715 * (h * h * h))))
        # Second linear: f32 accumulation, f32 bias, cast to output dtype.
        out = jnp.dot(g.astype(compute_dtype), w2_ref[...],
                      preferred_element_type=jnp.float32) + b2_ref[...]
        o_ref[...] = out.astype(o_ref.dtype)
    return kernel


def prepare_ffn_params(w1, b1, w2, b2, compute_dtype=jnp.bfloat16):
    """One-time parameter preparation (persistent bf16 weights, f32 biases).

    Done once at 'load' time so no per-call HBM cast passes are needed.
    """
    return (w1.astype(compute_dtype),
            b1.reshape(1, -1).astype(jnp.float32),
            w2.astype(compute_dtype),
            b2.reshape(1, -1).astype(jnp.float32))


def feedforward_pallas(x, w1, b1, w2, b2, *, tm=None, out_dtype=None):
    """x: (B, T, E) float32; w1:(E,4E) bf16, b1:(1,4E) f32, w2:(4E,E) bf16,
    b2:(1,E) f32 (from prepare_ffn_params). Returns (B, T, E) in out_dtype
    (defaults to x.dtype)."""
    B, T, E = x.shape
    H = w1.shape[1]                      # 4 * E
    M = B * T
    compute_dtype = w1.dtype             # bf16 from prepare_ffn_params
    out_dtype = x.dtype if out_dtype is None else out_dtype

    tm_cfg, vmem_limit, gelu_dtype, two_cores = _device_config()
    if tm is None:
        tm = tm_cfg

    # Row tile: multiple of 16 (bf16 sublane packing), capped at `tm`, never
    # larger than the (padded) number of rows.
    TM = min(tm, _round_up(M, 16))
    M_pad = _round_up(M, TM)
    # v7x (2 TensorCores): keep the number of grid steps even so neither core
    # sits idle / imbalanced.  Harmless (no-op) on single-TC v5e/v6e.
    if two_cores and (M_pad // TM) > 1 and (M_pad // TM) % 2 == 1:
        M_pad = _round_up(M_pad, 2 * TM)

    x2d = x.reshape(M, E)                # free reshape, no cast
    if M_pad != M:
        # Padded rows produce garbage (GELU(b1)@w2 + b2) and are sliced off
        # below -- keep that slice if this path is ever changed.
        x2d = jnp.pad(x2d, ((0, M_pad - M), (0, 0)))

    grid = (M_pad // TM,)

    wdt = jnp.dtype(compute_dtype).itemsize
    xdt = jnp.dtype(x.dtype).itemsize
    odt = jnp.dtype(out_dtype).itemsize
    cost = pl.CostEstimate(
        flops=4 * M_pad * E * H,              # two matmuls
        transcendentals=M_pad * H,            # one tanh per hidden element
        bytes_accessed=(M_pad * E * xdt       # x (f32, cast in-kernel)
                        + E * H * wdt         # w1 (bf16, resident)
                        + H * 4               # b1
                        + H * E * wdt         # w2 (bf16, resident)
                        + E * 4               # b2
                        + M_pad * E * odt),   # out
    )

    kernel = _make_ffn_kernel(compute_dtype, gelu_dtype)

    def build(single_buffer_weights):
        # Constant-index operands gain nothing from double-buffering; request
        # a single buffer to reclaim VMEM (lets TM stay large).
        res = (dict(pipeline_mode=pl.Buffered(1))
               if single_buffer_weights else {})
        return pl.pallas_call(
            kernel,
            out_shape=jax.ShapeDtypeStruct((M_pad, E), out_dtype),
            grid_spec=pltpu.PrefetchScalarGridSpec(
                num_scalar_prefetch=0,
                grid=grid,
                in_specs=[
                    pl.BlockSpec((TM, E), lambda i: (i, 0)),         # x stream
                    pl.BlockSpec((E, H), lambda i: (0, 0), **res),   # w1
                    pl.BlockSpec((1, H), lambda i: (0, 0), **res),   # b1
                    pl.BlockSpec((H, E), lambda i: (0, 0), **res),   # w2
                    pl.BlockSpec((1, E), lambda i: (0, 0), **res),   # b2
                ],
                out_specs=pl.BlockSpec((TM, E), lambda i: (i, 0)),
            ),
            compiler_params=pltpu.CompilerParams(
                dimension_semantics=("parallel",),
                vmem_limit_bytes=vmem_limit,
            ),
            cost_estimate=cost,
        )

    try:
        out2d = build(True)(x2d, w1, b1, w2, b2)
    except Exception:
        # Fallback for JAX builds where BlockSpec(pipeline_mode=Buffered(1))
        # is not supported on TPU pallas_call: default double-buffering
        # (identical numerics, slightly more VMEM).
        out2d = build(False)(x2d, w1, b1, w2, b2)

    if M_pad != M:
        out2d = out2d[:M]
    return out2d.reshape(B, T, E)


def feedforward_ref(x, w1, b1, w2, b2):
    h = jnp.dot(x, w1) + b1
    c = jnp.sqrt(2.0 / jnp.pi)
    g = 0.5 * h * (1.0 + jnp.tanh(c * (h + 0.044715 * h ** 3)))
    return jnp.dot(g, w2) + b2


if __name__ == "__main__":
    # cfg = {'emb_dim': 32}; small shapes: batch=2, seq=8
    B, T, E = 2, 8, 32
    H = 4 * E

    key = jax.random.PRNGKey(0)
    kx, kw1, kb1, kw2, kb2 = jax.random.split(key, 5)

    # Deterministic parameter init (uniform, ~ nn.Linear default scale)
    lim1 = 1.0 / jnp.sqrt(E)
    lim2 = 1.0 / jnp.sqrt(H)
    w1 = jax.random.uniform(kw1, (E, H), jnp.float32, -lim1, lim1)
    b1 = jax.random.uniform(kb1, (H,), jnp.float32, -lim1, lim1)
    w2 = jax.random.uniform(kw2, (H, E), jnp.float32, -lim2, lim2)
    b2 = jax.random.uniform(kb2, (E,), jnp.float32, -lim2, lim2)

    x = jax.random.normal(kx, (B, T, E), jnp.float32)

    # One-time parameter prep (persistent bf16 weights -> no per-call casts).
    params = prepare_ffn_params(w1, b1, w2, b2)

    out = feedforward_pallas(x, *params)
    out = jax.block_until_ready(out)

    ref = feedforward_ref(x, w1, b1, w2, b2)
    assert out.shape == (B, T, E)
    # bf16 MXU inputs (and bf16 GELU on v6e/v7x) with f32 accumulation ->
    # loosened tolerance vs the f32 PyTorch reference (documented precision
    # choice for GPT inference).
    assert jnp.allclose(out, ref, atol=2e-2, rtol=2e-2), "mismatch vs reference"

    print("KERNEL_OK")
</pallas_src>

<mosaic_0001>
module attributes {stable_mosaic.version = 11 : i64} {
  func.func @kernel(%arg0: i32, %arg1: memref<16x32xf32, #tpu.memory_space<vmem>>, %arg2: memref<32x128xbf16, #tpu.memory_space<vmem>>, %arg3: memref<1x128xf32, #tpu.memory_space<vmem>>, %arg4: memref<128x32xbf16, #tpu.memory_space<vmem>>, %arg5: memref<1x32xf32, #tpu.memory_space<vmem>>, %arg6: memref<16x32xf32, #tpu.memory_space<vmem>>) attributes {dimension_semantics = [#tpu.dimension_semantics<parallel>], iteration_bounds = array<i64: 1>, scalar_prefetch = 0 : i64, scratch_operands = 0 : i64, tpu.core_type = #tpu.core_type<tc>, window_params = [{transform_indices = @transform_0, window_bounds = array<i64: 16, 32>}, {pipeline_mode = #tpu.pipeline_mode<synchronous>, transform_indices = @transform_1, window_bounds = array<i64: 32, 128>}, {pipeline_mode = #tpu.pipeline_mode<synchronous>, transform_indices = @transform_2, window_bounds = array<i64: 1, 128>}, {pipeline_mode = #tpu.pipeline_mode<synchronous>, transform_indices = @transform_3, window_bounds = array<i64: 128, 32>}, {pipeline_mode = #tpu.pipeline_mode<synchronous>, transform_indices = @transform_4, window_bounds = array<i64: 1, 32>}, {transform_indices = @transform_5, window_bounds = array<i64: 16, 32>}]} {
    %c0 = arith.constant 0 : index
    %c0_0 = arith.constant 0 : index
    %0 = vector.load %arg1[%c0, %c0_0] : memref<16x32xf32, #tpu.memory_space<vmem>>, vector<16x32xf32>
    %1 = arith.truncf %0 : vector<16x32xf32> to vector<16x32xbf16>
    %c0_1 = arith.constant 0 : index
    %c0_2 = arith.constant 0 : index
    %2 = vector.load %arg2[%c0_1, %c0_2] : memref<32x128xbf16, #tpu.memory_space<vmem>>, vector<32x128xbf16>
    %cst = arith.constant dense<0.000000e+00> : vector<16x128xf32>
    %3 = tpu.matmul %1, %2, %cst {dimension_numbers = #tpu.dot_dimension_numbers<[1], [0], [0], [1], [0, 0, 1, 1], [], []>} : vector<16x32xbf16>, vector<32x128xbf16>, vector<16x128xf32> -> vector<16x128xf32>
    %c0_3 = arith.constant 0 : index
    %c0_4 = arith.constant 0 : index
    %4 = vector.load %arg3[%c0_3, %c0_4] : memref<1x128xf32, #tpu.memory_space<vmem>>, vector<1x128xf32>
    %5 = vector.broadcast %4 : vector<1x128xf32> to vector<16x128xf32>
    %6 = arith.addf %3, %5 : vector<16x128xf32>
    %cst_5 = arith.constant 5.000000e-01 : f32
    %7 = vector.broadcast %cst_5 : f32 to vector<16x128xf32>
    %8 = arith.mulf %7, %6 : vector<16x128xf32>
    %9 = arith.mulf %6, %6 : vector<16x128xf32>
    %10 = arith.mulf %9, %6 : vector<16x128xf32>
    %cst_6 = arith.constant 4.471500e-02 : f32
    %11 = vector.broadcast %cst_6 : f32 to vector<16x128xf32>
    %12 = arith.mulf %11, %10 : vector<16x128xf32>
    %13 = arith.addf %6, %12 : vector<16x128xf32>
    %cst_7 = arith.constant 0.797884583 : f32
    %14 = vector.broadcast %cst_7 : f32 to vector<16x128xf32>
    %15 = arith.mulf %14, %13 : vector<16x128xf32>
    %16 = math.tanh %15 : vector<16x128xf32>
    %cst_8 = arith.constant 1.000000e+00 : f32
    %17 = vector.broadcast %cst_8 : f32 to vector<16x128xf32>
    %18 = arith.addf %17, %16 : vector<16x128xf32>
    %19 = arith.mulf %8, %18 : vector<16x128xf32>
    %20 = arith.truncf %19 : vector<16x128xf32> to vector<16x128xbf16>
    %c0_9 = arith.constant 0 : index
    %c0_10 = arith.constant 0 : index
    %21 = vector.load %arg4[%c0_9, %c0_10] : memref<128x32xbf16, #tpu.memory_space<vmem>>, vector<128x32xbf16>
    %cst_11 = arith.constant dense<0.000000e+00> : vector<16x32xf32>
    %22 = tpu.matmul %20, %21, %cst_11 {dimension_numbers = #tpu.dot_dimension_numbers<[1], [0], [0], [1], [0, 0, 1, 1], [], []>} : vector<16x128xbf16>, vector<128x32xbf16>, vector<16x32xf32> -> vector<16x32xf32>
    %c0_12 = arith.constant 0 : index
    %c0_13 = arith.constant 0 : index
    %23 = vector.load %arg5[%c0_12, %c0_13] : memref<1x32xf32, #tpu.memory_space<vmem>>, vector<1x32xf32>
    %24 = vector.broadcast %23 : vector<1x32xf32> to vector<16x32xf32>
    %25 = arith.addf %22, %24 : vector<16x32xf32>
    %c0_14 = arith.constant 0 : index
    %c0_15 = arith.constant 0 : index
    %26 = vector.load %arg6[%c0_14, %c0_15] : memref<16x32xf32, #tpu.memory_space<vmem>>, vector<16x32xf32>
    tpu.vector_store %arg6[%c0_14, %c0_15], %25 {strides = array<i32>} : memref<16x32xf32, #tpu.memory_space<vmem>>, vector<16x32xf32>,
    return
  }
  func.func @transform_0(%arg0: i32) -> (i32, i32) {
    %c0_i32 = arith.constant 0 : i32
    %c0_i32_0 = arith.constant 0 : i32
    return %arg0, %c0_i32 : i32, i32
  }
  func.func @transform_1(%arg0: i32) -> (i32, i32) {
    %c0_i32 = arith.constant 0 : i32
    %c0_i32_0 = arith.constant 0 : i32
    %c0_i32_1 = arith.constant 0 : i32
    return %c0_i32, %c0_i32_0 : i32, i32
  }
  func.func @transform_2(%arg0: i32) -> (i32, i32) {
    %c0_i32 = arith.constant 0 : i32
    %c0_i32_0 = arith.constant 0 : i32
    %c0_i32_1 = arith.constant 0 : i32
    return %c0_i32, %c0_i32_0 : i32, i32
  }
  func.func @transform_3(%arg0: i32) -> (i32, i32) {
    %c0_i32 = arith.constant 0 : i32
    %c0_i32_0 = arith.constant 0 : i32
    %c0_i32_1 = arith.constant 0 : i32
    return %c0_i32, %c0_i32_0 : i32, i32
  }
  func.func @transform_4(%arg0: i32) -> (i32, i32) {
    %c0_i32 = arith.constant 0 : i32
    %c0_i32_0 = arith.constant 0 : i32
    %c0_i32_1 = arith.constant 0 : i32
    return %c0_i32, %c0_i32_0 : i32, i32
  }
  func.func @transform_5(%arg0: i32) -> (i32, i32) {
    %c0_i32 = arith.constant 0 : i32
    %c0_i32_0 = arith.constant 0 : i32
    return %arg0, %c0_i32 : i32, i32
  }
}

module attributes {stable_mosaic.version = 11 : i64} {
  func.func @kernel(%arg0: i32, %arg1: memref<16x32xf32, #tpu.memory_space<vmem>>, %arg2: memref<32x128xbf16, #tpu.memory_space<vmem>>, %arg3: memref<1x128xf32, #tpu.memory_space<vmem>>, %arg4: memref<128x32xbf16, #tpu.memory_space<vmem>>, %arg5: memref<1x32xf32, #tpu.memory_space<vmem>>, %arg6: memref<16x32xf32, #tpu.memory_space<vmem>>) attributes {dimension_semantics = [#tpu.dimension_semantics<parallel>], iteration_bounds = array<i64: 1>, scalar_prefetch = 0 : i64, scratch_operands = 0 : i64, tpu.core_type = #tpu.core_type<tc>, window_params = [{transform_indices = @transform_0, window_bounds = array<i64: 16, 32>}, {pipeline_mode = #tpu.pipeline_mode<synchronous>, transform_indices = @transform_1, window_bounds = array<i64: 32, 128>}, {pipeline_mode = #tpu.pipeline_mode<synchronous>, transform_indices = @transform_2, window_bounds = array<i64: 1, 128>}, {pipeline_mode = #tpu.pipeline_mode<synchronous>, transform_indices = @transform_3, window_bounds = array<i64: 128, 32>}, {pipeline_mode = #tpu.pipeline_mode<synchronous>, transform_indices = @transform_4, window_bounds = array<i64: 1, 32>}, {transform_indices = @transform_5, window_bounds = array<i64: 16, 32>}]} {
    %c0 = arith.constant 0 : index
    %c0_0 = arith.constant 0 : index
    %0 = vector.load %arg1[%c0, %c0_0] : memref<16x32xf32, #tpu.memory_space<vmem>>, vector<16x32xf32>
    %1 = arith.truncf %0 : vector<16x32xf32> to vector<16x32xbf16>
    %c0_1 = arith.constant 0 : index
    %c0_2 = arith.constant 0 : index
    %2 = vector.load %arg2[%c0_1, %c0_2] : memref<32x128xbf16, #tpu.memory_space<vmem>>, vector<32x128xbf16>
    %cst = arith.constant dense<0.000000e+00> : vector<16x128xf32>
    %3 = tpu.matmul %1, %2, %cst {dimension_numbers = #tpu.dot_dimension_numbers<[1], [0], [0], [1], [0, 0, 1, 1], [], []>} : vector<16x32xbf16>, vector<32x128xbf16>, vector<16x128xf32> -> vector<16x128xf32>
    %c0_3 = arith.constant 0 : index
    %c0_4 = arith.constant 0 : index
    %4 = vector.load %arg3[%c0_3, %c0_4] : memref<1x128xf32, #tpu.memory_space<vmem>>, vector<1x128xf32>
    %5 = vector.broadcast %4 : vector<1x128xf32> to vector<16x128xf32>
    %6 = arith.addf %3, %5 : vector<16x128xf32>
    %cst_5 = arith.constant 5.000000e-01 : f32
    %7 = vector.broadcast %cst_5 : f32 to vector<16x128xf32>
    %8 = arith.mulf %7, %6 : vector<16x128xf32>
    %9 = arith.mulf %6, %6 : vector<16x128xf32>
    %10 = arith.mulf %9, %6 : vector<16x128xf32>
    %cst_6 = arith.constant 4.471500e-02 : f32
    %11 = vector.broadcast %cst_6 : f32 to vector<16x128xf32>
    %12 = arith.mulf %11, %10 : vector<16x128xf32>
    %13 = arith.addf %6, %12 : vector<16x128xf32>
    %cst_7 = arith.constant 0.797884583 : f32
    %14 = vector.broadcast %cst_7 : f32 to vector<16x128xf32>
    %15 = arith.mulf %14, %13 : vector<16x128xf32>
    %16 = math.tanh %15 : vector<16x128xf32>
    %cst_8 = arith.constant 1.000000e+00 : f32
    %17 = vector.broadcast %cst_8 : f32 to vector<16x128xf32>
    %18 = arith.addf %17, %16 : vector<16x128xf32>
    %19 = arith.mulf %8, %18 : vector<16x128xf32>
    %20 = arith.truncf %19 : vector<16x128xf32> to vector<16x128xbf16>
    %c0_9 = arith.constant 0 : index
    %c0_10 = arith.constant 0 : index
    %21 = vector.load %arg4[%c0_9, %c0_10] : memref<128x32xbf16, #tpu.memory_space<vmem>>, vector<128x32xbf16>
    %cst_11 = arith.constant dense<0.000000e+00> : vector<16x32xf32>
    %22 = tpu.matmul %20, %21, %cst_11 {dimension_numbers = #tpu.dot_dimension_numbers<[1], [0], [0], [1], [0, 0, 1, 1], [], []>} : vector<16x128xbf16>, vector<128x32xbf16>, vector<16x32xf32> -> vector<16x32xf32>
    %c0_12 = arith.constant 0 : index
    %c0_13 = arith.constant 0 : index
    %23 = vector.load %arg5[%c0_12, %c0_13] : memref<1x32xf32, #tpu.memory_space<vmem>>, vector<1x32xf32>
    %24 = vector.broadcast %23 : vector<1x32xf32> to vector<16x32xf32>
    %25 = arith.addf %22, %24 : vector<16x32xf32>
    %c0_14 = arith.constant 0 : index
    %c0_15 = arith.constant 0 : index
    %26 = vector.load %arg6[%c0_14, %c0_15] : memref<16x32xf32, #tpu.memory_space<vmem>>, vector<16x32xf32>
    tpu.vector_store %arg6[%c0_14, %c0_15], %25 {strides = array<i32>} : memref<16x32xf32, #tpu.memory_space<vmem>>, vector<16x32xf32>,
    return
  }
  func.func @transform_0(%arg0: i32) -> (i32, i32) {
    %c0_i32 = arith.constant 0 : i32
    %c0_i32_0 = arith.constant 0 : i32
    return %arg0, %c0_i32 : i32, i32
  }
  func.func @transform_1(%arg0: i32) -> (i32, i32) {
    %c0_i32 = arith.constant 0 : i32
    %c0_i32_0 = arith.constant 0 : i32
    %c0_i32_1 = arith.constant 0 : i32
    return %c0_i32, %c0_i32_0 : i32, i32
  }
  func.func @transform_2(%arg0: i32) -> (i32, i32) {
    %c0_i32 = arith.constant 0 : i32
    %c0_i32_0 = arith.constant 0 : i32
    %c0_i32_1 = arith.constant 0 : i32
    return %c0_i32, %c0_i32_0 : i32, i32
  }
  func.func @transform_3(%arg0: i32) -> (i32, i32) {
    %c0_i32 = arith.constant 0 : i32
    %c0_i32_0 = arith.constant 0 : i32
    %c0_i32_1 = arith.constant 0 : i32
    return %c0_i32, %c0_i32_0 : i32, i32
  }
  func.func @transform_4(%arg0: i32) -> (i32, i32) {
    %c0_i32 = arith.constant 0 : i32
    %c0_i32_0 = arith.constant 0 : i32
    %c0_i32_1 = arith.constant 0 : i32
    return %c0_i32, %c0_i32_0 : i32, i32
  }
  func.func @transform_5(%arg0: i32) -> (i32, i32) {
    %c0_i32 = arith.constant 0 : i32
    %c0_i32_0 = arith.constant 0 : i32
    return %arg0, %c0_i32 : i32, i32
  }
}

</mosaic_0001>

<bundles_post_ra>
// kernel: tpu_custom_call.1
= control target key start
LH: loop header
LB: loop body
LE: loop exit
PB: predicated region body
PF: predicated region fallthrough
CT: control target
= control target key end

     0   :  { %10 = vsyncpa [#allocation3], 0  ;;  %s651_s0 = inlined_call_operand.hbm [shape: f32[16,32], index: 0, kind: input, shape index: {}]   ;;  %s652_s1 = inlined_call_operand.hbm [shape: bf16[32,128], index: 1, kind: input, shape index: {}]   ;;  %s653_s2 = inlined_call_operand.hbm [shape: f32[1,128], index: 2, kind: input, shape index: {}]   ;;  %s654_s3 = inlined_call_operand.hbm [shape: bf16[128,32], index: 3, kind: input, shape index: {}]   ;;  %s655_s4 = inlined_call_operand.hbm [shape: f32[1,32], index: 4, kind: input, shape index: {}]   ;;  %s656_s5 = inlined_call_operand.hbm [shape: f32[16,32], index: 5, kind: output, shape index: {}]  }
   0x1   :  { %11 = vsyncpa [#allocation6], 0 }
   0x2   :  { %12 = vsyncpa [#allocation9], 0 }
   0x3   :  { %13 = vsyncpa [#allocation4], 0  ;;  %s528_s18 = smov [#allocation5]   ;;  %s388_s22 = scalar_lea.hbm %s652_s1, 256 }
   0x4   :  { %s31_s19 = sshll.u32 %s528_s18, 4  ;;  %p389_p0 = scmp.ne.s32.totalorder %s652_s1, %s388_s22  ;;  %s32_s19 = int_to_ptr.vmem [resolvable:$true] %s31_s19 }
   0x5   :  { %p392_p1 = scmp.lt.u32.totalorder %s388_s22, %s652_s1 }
   0x7   :  { %p394_p2 = pnand %p392_p1, %p389_p0 }
   0x9   :  { %397 = shalt.err (!%p394_p2)
}
   0xa   :  { %s398_s27 = scalar_lea.vmem %s32_s19, 256  ;;  %p403_p4 = scmp.lt.s32.totalorder %s32_s19, %s32_s19 }
   0xb   :  { %p399_p3 = scmp.ne.s32.totalorder %s32_s19, %s398_s27  ;;  %p404_p5 = scmp.lt.s32.totalorder %s398_s27, %s398_s27 }
   0xd   :  { %p405_p6 = por %p404_p5, %p403_p4 }
   0xf   :  { %p406_p7 = pnand %p405_p6, %p399_p3 }
  0x11   :  { %409 = shalt.err (!%p406_p7)
}
  0x12   :  { %s529_s28 = smov 64   ;;  %s530_s29 = smov 4  }
  0x13   :  { %37 = dma.hbm_to_vmem [thread:$0]  %s652_s1, 256, %s32_s19, [#allocation6], %s529_s28, %s529_s28, %s530_s29  }
  0x14   :  { %s531_s7 = smov [#allocation8]   ;;  %s532_s9 = smov [#allocation2]  }
  0x15   :  { %s53_s8 = sshll.u32 %s531_s7, 4  ;;  %s19_s10 = sshll.u32 %s532_s9, 4  ;;  %s54_s8 = int_to_ptr.vmem [resolvable:$true] %s53_s8  ;;  %s20_s10 = int_to_ptr.vmem [resolvable:$true] %s19_s10 }
  0x16   :  { %s410_s13 = scalar_lea.hbm %s654_s3, 1024 }
  0x17   :  { %p411_p8 = scmp.ne.s32.totalorder %s654_s3, %s410_s13  ;;  %p414_p9 = scmp.lt.u32.totalorder %s410_s13, %s654_s3 }
  0x19   :  { %p416_p10 = pnand %p414_p9, %p411_p8 }
  0x1b   :  { %419 = shalt.err (!%p416_p10)
}
  0x1c   :  { %s420_s1 = scalar_lea.vmem %s54_s8, 1024  ;;  %p425_p12 = scmp.lt.s32.totalorder %s54_s8, %s54_s8 }
  0x1d   :  { %p421_p11 = scmp.ne.s32.totalorder %s54_s8, %s420_s1  ;;  %p426_p13 = scmp.lt.s32.totalorder %s420_s1, %s420_s1 }
  0x1f   :  { %p427_p0 = por %p426_p13, %p425_p12 }
  0x21   :  { %p428_p1 = pnand %p427_p0, %p421_p11 }
  0x23   :  { %431 = shalt.err (!%p428_p1)
}
  0x24   :  { %59 = dma.hbm_to_vmem [thread:$0]  %s654_s3, 1024, %s54_s8, [#allocation9], %s529_s28, %s529_s28, %s530_s29  }
  0x25   :  { %s432_s22 = scalar_lea.hbm %s651_s0, 256 }
  0x26   :  { %p433_p2 = scmp.ne.s32.totalorder %s651_s0, %s432_s22  ;;  %p436_p3 = scmp.lt.u32.totalorder %s432_s22, %s651_s0 }
  0x28   :  { %p438_p4 = pnand %p436_p3, %p433_p2 }
  0x2a   :  { %441 = shalt.err (!%p438_p4)
}
  0x2b   :  { %s442_s27 = scalar_lea.vmem %s20_s10, 256  ;;  %p447_p6 = scmp.lt.s32.totalorder %s20_s10, %s20_s10 }
  0x2c   :  { %p443_p5 = scmp.ne.s32.totalorder %s20_s10, %s442_s27  ;;  %p448_p7 = scmp.lt.s32.totalorder %s442_s27, %s442_s27 }
  0x2e   :  { %p449_p8 = por %p448_p7, %p447_p6 }
  0x30   :  { %p450_p9 = pnand %p449_p8, %p443_p5 }
  0x32   :  { %453 = shalt.err (!%p450_p9)
}
  0x33   :  { %s533_s3 = smov 128   ;;  %s534_s28 = smov 8  }
  0x34   :  { %25 = dma.hbm_to_vmem [thread:$0]  %s651_s0, 256, %s20_s10, [#allocation3], %s533_s3, %s533_s3, %s534_s28  }
  0x35   :  { %s535_s6 = smov [#allocation7]   ;;  %s536_s8 = smov [#allocation10]  }
  0x36   :  { %s44_s7 = sshll.u32 %s535_s6, 4  ;;  %s66_s9 = sshll.u32 %s536_s8, 4  ;;  %s45_s7 = int_to_ptr.vmem [resolvable:$true] %s44_s7  ;;  %s67_s9 = int_to_ptr.vmem [resolvable:$true] %s66_s9 }
  0x37   :  { %s454_s13 = scalar_lea.hbm %s653_s2, 16 }
  0x38   :  { %p455_p10 = scmp.ne.s32.totalorder %s653_s2, %s454_s13  ;;  %p458_p11 = scmp.lt.u32.totalorder %s454_s13, %s653_s2 }
  0x3a   :  { %p460_p12 = pnand %p458_p11, %p455_p10 }
  0x3c   :  { %463 = shalt.err (!%p460_p12)
}
  0x3d   :  { %s464_s0 = scalar_lea.vmem %s45_s7, 16  ;;  %s468_s10 = scalar_lea.vmem %s45_s7, 32 }
  0x3e   :  { %p465_p13 = scmp.ne.s32.totalorder %s45_s7, %s464_s0  ;;  %p469_p0 = scmp.lt.s32.totalorder %s45_s7, %s45_s7 }
  0x3f   :  { %p470_p1 = scmp.lt.s32.totalorder %s468_s10, %s464_s0 }
  0x41   :  { %p471_p2 = por %p470_p1, %p469_p0 }
  0x43   :  { %p472_p3 = pnand %p471_p2, %p465_p13 }
  0x45   :  { %475 = shalt.err (!%p472_p3)
}
  0x46   :  { %47 = dma.hbm_to_vmem [thread:$0]  %s653_s2, 16, %s45_s7, [#allocation6]  }
  0x47   :  { %s476_s21 = scalar_lea.hbm %s655_s4, 16 }
  0x48   :  { %p477_p4 = scmp.ne.s32.totalorder %s655_s4, %s476_s21  ;;  %p480_p5 = scmp.lt.u32.totalorder %s476_s21, %s655_s4 }
  0x4a   :  { %p482_p6 = pnand %p480_p5, %p477_p4 }
  0x4c   :  { %485 = shalt.err (!%p482_p6)
}
  0x4d   :  { %s486_s26 = scalar_lea.vmem %s67_s9, 16  ;;  %s490_s27 = scalar_lea.vmem %s67_s9, 32 }
  0x4e   :  { %p487_p7 = scmp.ne.s32.totalorder %s67_s9, %s486_s26  ;;  %p491_p8 = scmp.lt.s32.totalorder %s67_s9, %s67_s9 }
  0x4f   :  { %p492_p9 = scmp.lt.s32.totalorder %s490_s27, %s486_s26 }
  0x51   :  { %p493_p10 = por %p492_p9, %p491_p8 }
  0x53   :  { %p494_p11 = pnand %p493_p10, %p487_p7 }
  0x55   :  { %497 = shalt.err (!%p494_p11)
}
  0x56   :  { %69 = dma.hbm_to_vmem [thread:$0]  %s655_s4, 16, %s67_s9, [#allocation9]  }
  0x57   :  { %520 = dma.done.wait [#allocation3], 256  }
  0x58   :  { %521 = vsyncadd [#allocation3], 4294967040 }
  0x59   :  { %522 = dma.done.wait [#allocation6], 272  }
  0x5a   :  { %523 = vsyncadd [#allocation6], 4294967024 }
  0x5b   :  { %524 = dma.done.wait [#allocation9], 1040  }
  0x5c   :  { %525 = vsyncadd [#allocation9], 4294966256  ;;  %v537_v0 = vmov 0.0   ;;  %vm538_vm0 = vmmov 0   ;;  %v374_v1 = vld [vmem:[#allocation5] sm:$0xff]   ;;  %v375_v2 = vld [vmem:[#allocation5 + $0x8] sm:$0xff]  }
  0x5d   :  { %334 = vmatprep.subr.bf16.mxu0 %v537_v0  ;;  %338 = vmatprep.mubr.msk.bf16.mxu0 %vm538_vm0, %v537_v0  ;;  %v86_v3 = vld [vmem:[#allocation2] sm:$0xff]  ;;  %v87_v4 = vld [vmem:[#allocation2 + $0x8] sm:$0xff]  ;;  %vm112_vm1 = vcmask 261120   ;;  %v378_v8 = vld [vmem:[#allocation8 + $0x10] sm:$0xff]   ;;  %s539_s4 = smov [#allocation11]  }
  0x5e   :  { %342 = vmatprep.subr.bf16.mxu1 %v537_v0  ;;  %358 = vmatprep.mubr.msk.bf16.mxu1 %vm538_vm0, %v537_v0  ;;  %v88_v5 = vpack.c.bf16 %v87_v4, %v86_v3  ;;  %v376_v6 = vld [vmem:[#allocation8] sm:$0xff]   ;;  %v377_v7 = vld [vmem:[#allocation8 + $0x8] sm:$0xff]   ;;  %v379_v9 = vld [vmem:[#allocation8 + $0x18] sm:$0xff]   ;;  %s295_s30 = sshll.u32 %s539_s4, 4  ;;  %s296_s30 = int_to_ptr.vmem [resolvable:$true] %s295_s30 }
  0x5f   :  { %335 = vmatpush3.bf16.msra.mxu0 %v374_v1  ;;  %343 = vmatpush3.bf16.msra.mxu1 %v376_v6  ;;  %v380_v10 = vld [vmem:[#allocation8 + $0x20] sm:$0xff]   ;;  %v381_v11 = vld [vmem:[#allocation8 + $0x28] sm:$0xff]   ;;  %v382_v12 = vld [vmem:[#allocation8 + $0x30] sm:$0xff]   ;;  %s498_s6 = scalar_lea.vmem %s296_s30, 256  ;;  %p503_p13 = scmp.lt.s32.totalorder %s296_s30, %s296_s30 }
  0x60   :  { %336 = vmatprep.subr.bf16.mxu0 %v537_v0  ;;  %344 = vmatprep.subr.bf16.mxu1 %v537_v0  ;;  %v383_v13 = vld [vmem:[#allocation8 + $0x38] sm:$0xff]   ;;  %v313_v40 = vld [vmem:[#allocation10] ss:$0 sm:$0xff]  ;;  %p499_p12 = scmp.ne.s32.totalorder %s296_s30, %s498_s6  ;;  %p504_p0 = scmp.lt.s32.totalorder %s498_s6, %s498_s6 }
  0x61   :  { %v309_v14 = vld [vmem:[#allocation7] ss:$0 sm:$0xff] }
  0x62   :  { %p505_p1 = por %p504_p0, %p503_p13 }
  0x63   :  { %337 = vmatpush3.bf16.msra.mxu0 %v375_v2  ;;  %345 = vmatpush3.bf16.msra.mxu1 %v377_v7 }
  0x64   :  { %346 = vmatprep.subr.bf16.mxu1 %v537_v0  ;;  %p506_p2 = pnand %p505_p1, %p499_p12 }
  0x66   :  { %339 = vmatmul.mubr.msk.bf16.vlgmr.msra.gmra.mrb[0].mxu0 %vm112_vm1, %v88_v5 }
  0x67   :  { %347 = vmatpush3.bf16.msra.mxu1 %v378_v8 }
  0x68   :  { %348 = vmatprep.subr.bf16.mxu1 %v537_v0 }
  0x6b   :  { %349 = vmatpush3.bf16.msra.mxu1 %v379_v9 }
  0x6c   :  { %350 = vmatprep.subr.bf16.mxu1 %v537_v0 }
  0x6f   :  { %351 = vmatpush3.bf16.msra.mxu1 %v380_v10 }
  0x70   :  { %352 = vmatprep.subr.bf16.mxu1 %v537_v0 }
  0x73   :  { %353 = vmatpush3.bf16.msra.mxu1 %v381_v11 }
  0x74   :  { %354 = vmatprep.subr.bf16.mxu1 %v537_v0 }
  0x77   :  { %355 = vmatpush3.bf16.msra.mxu1 %v382_v12 }
  0x78   :  { %356 = vmatprep.subr.bf16.mxu1 %v537_v0 }
  0x7b   :  { %357 = vmatpush3.bf16.msra.mxu1 %v383_v13 }
 0x139   :  { %v150_v15 = vpop.f32.mrb[0].mxu0 }
 0x13a   :  { %v151_v16 = vadd.f32 %v309_v14, %v150_v15  ;;  %v340_v17 = vpop.f32.mrb[1].mxu0 }
 0x13b   :  { %v153_v18 = vpop.f32.mrb[2].mxu0 }
 0x13c   :  { %v159_v19 = vmul.f32 %v151_v16, %v151_v16  ;;  %v154_v20 = vadd.f32 %v309_v14, %v153_v18  ;;  %v341_v21 = vpop.f32.mrb[3].mxu0  ;;  %v157_v34 = vmul.f32 0.5, %v151_v16 }
 0x13e   :  { %v161_v22 = vmul.f32 %v159_v19, %v151_v16  ;;  %v160_v23 = vmul.f32 %v154_v20, %v154_v20  ;;  %v158_v35 = vmul.f32 0.5, %v154_v20 }
 0x140   :  { %v163_v24 = vmul.f32 0.044715, %v161_v22  ;;  %v162_v25 = vmul.f32 %v160_v23, %v154_v20 }
 0x142   :  { %v165_v26 = vadd.f32 %v163_v24, %v151_v16  ;;  %v164_v27 = vmul.f32 0.044715, %v162_v25 }
 0x144   :  { %v167_v28 = vmul.f32 0.7978846, %v165_v26  ;;  %v166_v29 = vadd.f32 %v164_v27, %v154_v20 }
 0x146   :  { %384 = vtanh.f32 %v167_v28  ;;  %v168_v30 = vmul.f32 0.7978846, %v166_v29 }
 0x148   :  { %386 = vtanh.f32 %v168_v30 }
 0x150   :  { %v385_v31 = vpop.eup %384 }
 0x151   :  { %v171_v32 = vadd.f32 1.0, %v385_v31 }
 0x152   :  { %v387_v33 = vpop.eup %386 }
 0x153   :  { %v172_v36 = vadd.f32 1.0, %v387_v33  ;;  %v173_v37 = vmul.f32 %v171_v32, %v157_v34 }
 0x155   :  { %v174_v38 = vmul.f32 %v172_v36, %v158_v35 }
 0x157   :  { %v175_v39 = vpack.c.bf16 %v174_v38, %v173_v37 }
 0x159   :  { %359 = vmatmul.mubr.bf16.vlgmr.msra.gmra.mrb[0].mxu1 %v175_v39 }
 0x22c   :  { %v281_v41 = vpop.f32.mrb[0].mxu1 }
 0x22d   :  { %v282_v42 = vadd.f32 %v313_v40, %v281_v41  ;;  %v360_v43 = vpop.f32.mrb[1].mxu1 }
 0x22e   :  { %v284_v44 = vpop.f32.mrb[2].mxu1 }
 0x22f   :  { %288 = vst.msk [vmem:[#allocation11] sm:$0xff] %vm112_vm1, %v282_v42  ;;  %v285_v45 = vadd.f32 %v313_v40, %v284_v44  ;;  %v361_v46 = vpop.f32.mrb[3].mxu1 }
 0x231   :  { %289 = vst.msk [vmem:[#allocation11 + $0x8] sm:$0xff] %vm112_vm1, %v285_v45 }
 0x232   :  { %509 = shalt.err (!%p506_p2)
}
 0x233   :  { %s510_s9 = scalar_lea.hbm %s656_s5, 256 }
 0x234   :  { %p511_p3 = scmp.ne.s32.totalorder %s656_s5, %s510_s9  ;;  %p514_p4 = scmp.lt.u32.totalorder %s510_s9, %s656_s5 }
 0x236   :  { %p516_p5 = pnand %p514_p4, %p511_p3 }
 0x238   :  { %519 = shalt.err (!%p516_p5)
}
 0x239   :  { %301 = dma.vmem_to_hbm [thread:$0]  %s296_s30, 256, %s656_s5, [#allocation4], %s533_s3, %s533_s3, %s534_s28  }
 0x23a   :  { %526 = dma.done.wait [#allocation4], 256  }
 0x23b   :  { %527 = vsyncadd [#allocation4], 4294967040 }
 0x23c   :  { %305 = vsyncpa [#allocation3], 1 }
 0x23d   :  { %306 = vsyncpa [#allocation6], 1 }
 0x23e   :  { %307 = vsyncpa [#allocation9], 1 }
 0x23f   :  { %308 = vsyncpa [#allocation4], 1 }

// kernel: tpu_custom_call.1
= control target key start
LH: loop header
LB: loop body
LE: loop exit
PB: predicated region body
PF: predicated region fallthrough
CT: control target
= control target key end

     0   :  { %10 = vsyncpa [#allocation3], 0  ;;  %s651_s0 = inlined_call_operand.hbm [shape: f32[16,32], index: 0, kind: input, shape index: {}]   ;;  %s652_s1 = inlined_call_operand.hbm [shape: bf16[32,128], index: 1, kind: input, shape index: {}]   ;;  %s653_s2 = inlined_call_operand.hbm [shape: f32[1,128], index: 2, kind: input, shape index: {}]   ;;  %s654_s3 = inlined_call_operand.hbm [shape: bf16[128,32], index: 3, kind: input, shape index: {}]   ;;  %s655_s4 = inlined_call_operand.hbm [shape: f32[1,32], index: 4, kind: input, shape index: {}]   ;;  %s656_s5 = inlined_call_operand.hbm [shape: f32[16,32], index: 5, kind: output, shape index: {}]  }
   0x1   :  { %11 = vsyncpa [#allocation6], 0 }
   0x2   :  { %12 = vsyncpa [#allocation9], 0 }
   0x3   :  { %13 = vsyncpa [#allocation4], 0  ;;  %s528_s18 = smov [#allocation5]   ;;  %s388_s22 = scalar_lea.hbm %s652_s1, 256 }
   0x4   :  { %s31_s19 = sshll.u32 %s528_s18, 4  ;;  %p389_p0 = scmp.ne.s32.totalorder %s652_s1, %s388_s22  ;;  %s32_s19 = int_to_ptr.vmem [resolvable:$true] %s31_s19 }
   0x5   :  { %p392_p1 = scmp.lt.u32.totalorder %s388_s22, %s652_s1 }
   0x7   :  { %p394_p2 = pnand %p392_p1, %p389_p0 }
   0x9   :  { %397 = shalt.err (!%p394_p2)
}
   0xa   :  { %s398_s27 = scalar_lea.vmem %s32_s19, 256  ;;  %p403_p4 = scmp.lt.s32.totalorder %s32_s19, %s32_s19 }
   0xb   :  { %p399_p3 = scmp.ne.s32.totalorder %s32_s19, %s398_s27  ;;  %p404_p5 = scmp.lt.s32.totalorder %s398_s27, %s398_s27 }
   0xd   :  { %p405_p6 = por %p404_p5, %p403_p4 }
   0xf   :  { %p406_p7 = pnand %p405_p6, %p399_p3 }
  0x11   :  { %409 = shalt.err (!%p406_p7)
}
  0x12   :  { %s529_s28 = smov 64   ;;  %s530_s29 = smov 4  }
  0x13   :  { %37 = dma.hbm_to_vmem [thread:$0]  %s652_s1, 256, %s32_s19, [#allocation6], %s529_s28, %s529_s28, %s530_s29  }
  0x14   :  { %s531_s7 = smov [#allocation8]   ;;  %s532_s9 = smov [#allocation2]  }
  0x15   :  { %s53_s8 = sshll.u32 %s531_s7, 4  ;;  %s19_s10 = sshll.u32 %s532_s9, 4  ;;  %s54_s8 = int_to_ptr.vmem [resolvable:$true] %s53_s8  ;;  %s20_s10 = int_to_ptr.vmem [resolvable:$true] %s19_s10 }
  0x16   :  { %s410_s13 = scalar_lea.hbm %s654_s3, 1024 }
  0x17   :  { %p411_p8 = scmp.ne.s32.totalorder %s654_s3, %s410_s13  ;;  %p414_p9 = scmp.lt.u32.totalorder %s410_s13, %s654_s3 }
  0x19   :  { %p416_p10 = pnand %p414_p9, %p411_p8 }
  0x1b   :  { %419 = shalt.err (!%p416_p10)
}
  0x1c   :  { %s420_s1 = scalar_lea.vmem %s54_s8, 1024  ;;  %p425_p12 = scmp.lt.s32.totalorder %s54_s8, %s54_s8 }
  0x1d   :  { %p421_p11 = scmp.ne.s32.totalorder %s54_s8, %s420_s1  ;;  %p426_p13 = scmp.lt.s32.totalorder %s420_s1, %s420_s1 }
  0x1f   :  { %p427_p0 = por %p426_p13, %p425_p12 }
  0x21   :  { %p428_p1 = pnand %p427_p0, %p421_p11 }
  0x23   :  { %431 = shalt.err (!%p428_p1)
}
  0x24   :  { %59 = dma.hbm_to_vmem [thread:$0]  %s654_s3, 1024, %s54_s8, [#allocation9], %s529_s28, %s529_s28, %s530_s29  }
  0x25   :  { %s432_s22 = scalar_lea.hbm %s651_s0, 256 }
  0x26   :  { %p433_p2 = scmp.ne.s32.totalorder %s651_s0, %s432_s22  ;;  %p436_p3 = scmp.lt.u32.totalorder %s432_s22, %s651_s0 }
  0x28   :  { %p438_p4 = pnand %p436_p3, %p433_p2 }
  0x2a   :  { %441 = shalt.err (!%p438_p4)
}
  0x2b   :  { %s442_s27 = scalar_lea.vmem %s20_s10, 256  ;;  %p447_p6 = scmp.lt.s32.totalorder %s20_s10, %s20_s10 }
  0x2c   :  { %p443_p5 = scmp.ne.s32.totalorder %s20_s10, %s442_s27  ;;  %p448_p7 = scmp.lt.s32.totalorder %s442_s27, %s442_s27 }
  0x2e   :  { %p449_p8 = por %p448_p7, %p447_p6 }
  0x30   :  { %p450_p9 = pnand %p449_p8, %p443_p5 }
  0x32   :  { %453 = shalt.err (!%p450_p9)
}
  0x33   :  { %s533_s3 = smov 128   ;;  %s534_s28 = smov 8  }
  0x34   :  { %25 = dma.hbm_to_vmem [thread:$0]  %s651_s0, 256, %s20_s10, [#allocation3], %s533_s3, %s533_s3, %s534_s28  }
  0x35   :  { %s535_s6 = smov [#allocation7]   ;;  %s536_s8 = smov [#allocation10]  }
  0x36   :  { %s44_s7 = sshll.u32 %s535_s6, 4  ;;  %s66_s9 = sshll.u32 %s536_s8, 4  ;;  %s45_s7 = int_to_ptr.vmem [resolvable:$true] %s44_s7  ;;  %s67_s9 = int_to_ptr.vmem [resolvable:$true] %s66_s9 }
  0x37   :  { %s454_s13 = scalar_lea.hbm %s653_s2, 16 }
  0x38   :  { %p455_p10 = scmp.ne.s32.totalorder %s653_s2, %s454_s13  ;;  %p458_p11 = scmp.lt.u32.totalorder %s454_s13, %s653_s2 }
  0x3a   :  { %p460_p12 = pnand %p458_p11, %p455_p10 }
  0x3c   :  { %463 = shalt.err (!%p460_p12)
}
  0x3d   :  { %s464_s0 = scalar_lea.vmem %s45_s7, 16  ;;  %s468_s10 = scalar_lea.vmem %s45_s7, 32 }
  0x3e   :  { %p465_p13 = scmp.ne.s32.totalorder %s45_s7, %s464_s0  ;;  %p469_p0 = scmp.lt.s32.totalorder %s45_s7, %s45_s7 }
  0x3f   :  { %p470_p1 = scmp.lt.s32.totalorder %s468_s10, %s464_s0 }
  0x41   :  { %p471_p2 = por %p470_p1, %p469_p0 }
  0x43   :  { %p472_p3 = pnand %p471_p2, %p465_p13 }
  0x45   :  { %475 = shalt.err (!%p472_p3)
}
  0x46   :  { %47 = dma.hbm_to_vmem [thread:$0]  %s653_s2, 16, %s45_s7, [#allocation6]  }
  0x47   :  { %s476_s21 = scalar_lea.hbm %s655_s4, 16 }
  0x48   :  { %p477_p4 = scmp.ne.s32.totalorder %s655_s4, %s476_s21  ;;  %p480_p5 = scmp.lt.u32.totalorder %s476_s21, %s655_s4 }
  0x4a   :  { %p482_p6 = pnand %p480_p5, %p477_p4 }
  0x4c   :  { %485 = shalt.err (!%p482_p6)
}
  0x4d   :  { %s486_s26 = scalar_lea.vmem %s67_s9, 16  ;;  %s490_s27 = scalar_lea.vmem %s67_s9, 32 }
  0x4e   :  { %p487_p7 = scmp.ne.s32.totalorder %s67_s9, %s486_s26  ;;  %p491_p8 = scmp.lt.s32.totalorder %s67_s9, %s67_s9 }
  0x4f   :  { %p492_p9 = scmp.lt.s32.totalorder %s490_s27, %s486_s26 }
  0x51   :  { %p493_p10 = por %p492_p9, %p491_p8 }
  0x53   :  { %p494_p11 = pnand %p493_p10, %p487_p7 }
  0x55   :  { %497 = shalt.err (!%p494_p11)
}
  0x56   :  { %69 = dma.hbm_to_vmem [thread:$0]  %s655_s4, 16, %s67_s9, [#allocation9]  }
  0x57   :  { %520 = dma.done.wait [#allocation3], 256  }
  0x58   :  { %521 = vsyncadd [#allocation3], 4294967040 }
  0x59   :  { %522 = dma.done.wait [#allocation6], 272  }
  0x5a   :  { %523 = vsyncadd [#allocation6], 4294967024 }
  0x5b   :  { %524 = dma.done.wait [#allocation9], 1040  }
  0x5c   :  { %525 = vsyncadd [#allocation9], 4294966256  ;;  %v537_v0 = vmov 0.0   ;;  %vm538_vm0 = vmmov 0   ;;  %v374_v1 = vld [vmem:[#allocation5] sm:$0xff]   ;;  %v375_v2 = vld [vmem:[#allocation5 + $0x8] sm:$0xff]  }
  0x5d   :  { %334 = vmatprep.subr.bf16.mxu0 %v537_v0  ;;  %338 = vmatprep.mubr.msk.bf16.mxu0 %vm538_vm0, %v537_v0  ;;  %v86_v3 = vld [vmem:[#allocation2] sm:$0xff]  ;;  %v87_v4 = vld [vmem:[#allocation2 + $0x8] sm:$0xff]  ;;  %vm112_vm1 = vcmask 261120   ;;  %v378_v8 = vld [vmem:[#allocation8 + $0x10] sm:$0xff]   ;;  %s539_s4 = smov [#allocation11]  }
  0x5e   :  { %342 = vmatprep.subr.bf16.mxu1 %v537_v0  ;;  %358 = vmatprep.mubr.msk.bf16.mxu1 %vm538_vm0, %v537_v0  ;;  %v88_v5 = vpack.c.bf16 %v87_v4, %v86_v3  ;;  %v376_v6 = vld [vmem:[#allocation8] sm:$0xff]   ;;  %v377_v7 = vld [vmem:[#allocation8 + $0x8] sm:$0xff]   ;;  %v379_v9 = vld [vmem:[#allocation8 + $0x18] sm:$0xff]   ;;  %s295_s30 = sshll.u32 %s539_s4, 4  ;;  %s296_s30 = int_to_ptr.vmem [resolvable:$true] %s295_s30 }
  0x5f   :  { %335 = vmatpush3.bf16.msra.mxu0 %v374_v1  ;;  %343 = vmatpush3.bf16.msra.mxu1 %v376_v6  ;;  %v380_v10 = vld [vmem:[#allocation8 + $0x20] sm:$0xff]   ;;  %v381_v11 = vld [vmem:[#allocation8 + $0x28] sm:$0xff]   ;;  %v382_v12 = vld [vmem:[#allocation8 + $0x30] sm:$0xff]   ;;  %s498_s6 = scalar_lea.vmem %s296_s30, 256  ;;  %p503_p13 = scmp.lt.s32.totalorder %s296_s30, %s296_s30 }
  0x60   :  { %336 = vmatprep.subr.bf16.mxu0 %v537_v0  ;;  %344 = vmatprep.subr.bf16.mxu1 %v537_v0  ;;  %v383_v13 = vld [vmem:[#allocation8 + $0x38] sm:$0xff]   ;;  %v313_v40 = vld [vmem:[#allocation10] ss:$0 sm:$0xff]  ;;  %p499_p12 = scmp.ne.s32.totalorder %s296_s30, %s498_s6  ;;  %p504_p0 = scmp.lt.s32.totalorder %s498_s6, %s498_s6 }
  0x61   :  { %v309_v14 = vld [vmem:[#allocation7] ss:$0 sm:$0xff] }
  0x62   :  { %p505_p1 = por %p504_p0, %p503_p13 }
  0x63   :  { %337 = vmatpush3.bf16.msra.mxu0 %v375_v2  ;;  %345 = vmatpush3.bf16.msra.mxu1 %v377_v7 }
  0x64   :  { %346 = vmatprep.subr.bf16.mxu1 %v537_v0  ;;  %p506_p2 = pnand %p505_p1, %p499_p12 }
  0x66   :  { %339 = vmatmul.mubr.msk.bf16.vlgmr.msra.gmra.mrb[0].mxu0 %vm112_vm1, %v88_v5 }
  0x67   :  { %347 = vmatpush3.bf16.msra.mxu1 %v378_v8 }
  0x68   :  { %348 = vmatprep.subr.bf16.mxu1 %v537_v0 }
  0x6b   :  { %349 = vmatpush3.bf16.msra.mxu1 %v379_v9 }
  0x6c   :  { %350 = vmatprep.subr.bf16.mxu1 %v537_v0 }
  0x6f   :  { %351 = vmatpush3.bf16.msra.mxu1 %v380_v10 }
  0x70   :  { %352 = vmatprep.subr.bf16.mxu1 %v537_v0 }
  0x73   :  { %353 = vmatpush3.bf16.msra.mxu1 %v381_v11 }
  0x74   :  { %354 = vmatprep.subr.bf16.mxu1 %v537_v0 }
  0x77   :  { %355 = vmatpush3.bf16.msra.mxu1 %v382_v12 }
  0x78   :  { %356 = vmatprep.subr.bf16.mxu1 %v537_v0 }
  0x7b   :  { %357 = vmatpush3.bf16.msra.mxu1 %v383_v13 }
 0x139   :  { %v150_v15 = vpop.f32.mrb[0].mxu0 }
 0x13a   :  { %v151_v16 = vadd.f32 %v309_v14, %v150_v15  ;;  %v340_v17 = vpop.f32.mrb[1].mxu0 }
 0x13b   :  { %v153_v18 = vpop.f32.mrb[2].mxu0 }
 0x13c   :  { %v159_v19 = vmul.f32 %v151_v16, %v151_v16  ;;  %v154_v20 = vadd.f32 %v309_v14, %v153_v18  ;;  %v341_v21 = vpop.f32.mrb[3].mxu0  ;;  %v157_v34 = vmul.f32 0.5, %v151_v16 }
 0x13e   :  { %v161_v22 = vmul.f32 %v159_v19, %v151_v16  ;;  %v160_v23 = vmul.f32 %v154_v20, %v154_v20  ;;  %v158_v35 = vmul.f32 0.5, %v154_v20 }
 0x140   :  { %v163_v24 = vmul.f32 0.044715, %v161_v22  ;;  %v162_v25 = vmul.f32 %v160_v23, %v154_v20 }
 0x142   :  { %v165_v26 = vadd.f32 %v163_v24, %v151_v16  ;;  %v164_v27 = vmul.f32 0.044715, %v162_v25 }
 0x144   :  { %v167_v28 = vmul.f32 0.7978846, %v165_v26  ;;  %v166_v29 = vadd.f32 %v164_v27, %v154_v20 }
 0x146   :  { %384 = vtanh.f32 %v167_v28  ;;  %v168_v30 = vmul.f32 0.7978846, %v166_v29 }
 0x148   :  { %386 = vtanh.f32 %v168_v30 }
 0x150   :  { %v385_v31 = vpop.eup %384 }
 0x151   :  { %v171_v32 = vadd.f32 1.0, %v385_v31 }
 0x152   :  { %v387_v33 = vpop.eup %386 }
 0x153   :  { %v172_v36 = vadd.f32 1.0, %v387_v33  ;;  %v173_v37 = vmul.f32 %v171_v32, %v157_v34 }
 0x155   :  { %v174_v38 = vmul.f32 %v172_v36, %v158_v35 }
 0x157   :  { %v175_v39 = vpack.c.bf16 %v174_v38, %v173_v37 }
 0x159   :  { %359 = vmatmul.mubr.bf16.vlgmr.msra.gmra.mrb[0].mxu1 %v175_v39 }
 0x22c   :  { %v281_v41 = vpop.f32.mrb[0].mxu1 }
 0x22d   :  { %v282_v42 = vadd.f32 %v313_v40, %v281_v41  ;;  %v360_v43 = vpop.f32.mrb[1].mxu1 }
 0x22e   :  { %v284_v44 = vpop.f32.mrb[2].mxu1 }
 0x22f   :  { %288 = vst.msk [vmem:[#allocation11] sm:$0xff] %vm112_vm1, %v282_v42  ;;  %v285_v45 = vadd.f32 %v313_v40, %v284_v44  ;;  %v361_v46 = vpop.f32.mrb[3].mxu1 }
 0x231   :  { %289 = vst.msk [vmem:[#allocation11 + $0x8] sm:$0xff] %vm112_vm1, %v285_v45 }
 0x232   :  { %509 = shalt.err (!%p506_p2)
}
 0x233   :  { %s510_s9 = scalar_lea.hbm %s656_s5, 256 }
 0x234   :  { %p511_p3 = scmp.ne.s32.totalorder %s656_s5, %s510_s9  ;;  %p514_p4 = scmp.lt.u32.totalorder %s510_s9, %s656_s5 }
 0x236   :  { %p516_p5 = pnand %p514_p4, %p511_p3 }
 0x238   :  { %519 = shalt.err (!%p516_p5)
}
 0x239   :  { %301 = dma.vmem_to_hbm [thread:$0]  %s296_s30, 256, %s656_s5, [#allocation4], %s533_s3, %s533_s3, %s534_s28  }
 0x23a   :  { %526 = dma.done.wait [#allocation4], 256  }
 0x23b   :  { %527 = vsyncadd [#allocation4], 4294967040 }
 0x23c   :  { %305 = vsyncpa [#allocation3], 1 }
 0x23d   :  { %306 = vsyncpa [#allocation6], 1 }
 0x23e   :  { %307 = vsyncpa [#allocation9], 1 }
 0x23f   :  { %308 = vsyncpa [#allocation4], 1 }

</bundles_post_ra>
